<compile_context>
chip_gen: v5e
topology: v5e:2x2
jax: 0.10.0
libtpu: 0.0.40
codegen_flags: <defaults>
</compile_context>

<pallas_src>
import math
from functools import partial

import jax
import jax.numpy as jnp
from jax.experimental import pallas as pl
from jax.experimental.pallas import tpu as pltpu


def _label_smoothing_kl_kernel(logp_ref, tgt_ref, part_ref, *,
                               confidence, smoothing_value, ignore_index,
                               batch, vocab):
    i = pl.program_id(0)          # batch-tile index ("parallel")
    j = pl.program_id(1)          # vocab-tile index ("arbitrary", reduction)
    TB, TV = logp_ref.shape

    # Upcast in-vreg (free vs. memory); input may be bf16.
    logp = logp_ref[...].astype(jnp.float32)           # (TB, TV)
    tgt = tgt_ref[...]                                  # (TB, 1) int32

    # Global row/col indices for masking partial tiles + target match.
    row = i * TB + jax.lax.broadcasted_iota(jnp.int32, (TB, TV), 0)
    col = j * TV + jax.lax.broadcasted_iota(jnp.int32, (TB, TV), 1)

    valid = (row < batch) & (col < vocab) & (tgt != ignore_index)
    # Mask logp itself so garbage (even NaN) in padded regions cannot leak.
    logp_m = jnp.where(valid, logp, jnp.float32(0.0))

    # model_prob * logp for this tile:
    #   smoothing_value everywhere, confidence at the target column.
    weight = jnp.where(col == tgt,
                       jnp.float32(confidence),
                       jnp.float32(smoothing_value))
    contrib = weight * logp_m                           # (TB, TV)

    # Fold the vocab tile into a lane-dense (TB, 128) partial sum (no per-step
    # cross-lane collapse; the final scalar reduce happens outside the kernel).
    if TV % 128 == 0:
        part = contrib[:, 0:128]
        for c in range(1, TV // 128):
            part = part + contrib[:, c * 128:(c + 1) * 128]
    else:
        # TV == full (non-128-multiple) vocab: row-reduce, park in lane 0.
        rowsum = jnp.sum(contrib, axis=1, keepdims=True)            # (TB, 1)
        lane = jax.lax.broadcasted_iota(jnp.int32, (TB, 128), 1)
        part = jnp.where(lane == 0, rowsum, jnp.float32(0.0))

    @pl.when(j == 0)
    def _():
        part_ref[...] = jnp.zeros_like(part_ref)

    part_ref[...] = part_ref[...] + part


class LabelSmoothingLossPallas:
    """Pallas TPU port of the PyTorch LabelSmoothingLoss forward pass.

    loss = F.kl_div(output, model_prob, reduction='sum')
         = C_row * (#rows with tgt != ignore_index) - sum(model_prob * output)
    where C_row = conf*log(conf) + (V-1)*sv*log(sv) is a compile-time constant.
    """

    def __init__(self, label_smoothing, tgt_vocab_size, ignore_index=-100,
                 block_batch=256, block_vocab=2048):
        assert 0.0 < label_smoothing <= 1.0
        self.ignore_index = ignore_index
        self.tgt_vocab_size = tgt_vocab_size
        self.smoothing_value = label_smoothing / (tgt_vocab_size - 2)
        self.confidence = 1.0 - label_smoothing
        self.block_batch = block_batch
        self.block_vocab = block_vocab

        # Closed-form entropy term per non-ignored row (exact, not approx).
        ent = (tgt_vocab_size - 1) * self.smoothing_value * math.log(self.smoothing_value)
        if self.confidence > 0.0:
            ent += self.confidence * math.log(self.confidence)
        self.row_entropy = float(ent)

    def __call__(self, output, target):
        """
        output: (batch, vocab) f32 or bf16 log-probabilities
        target: (batch,) int
        returns scalar f32 loss (sum-reduced KL divergence)
        """
        B, V = output.shape
        assert V == self.tgt_vocab_size

        # Tile selection: last two dims must be multiples of (8, 128) or the
        # full extent. Tiles are sized to stay well inside v5e's 16 MiB scoped
        # VMEM default even when double-buffered; re-derive for v7x (64 MiB).
        TB = self.block_batch if B >= self.block_batch else B
        TV = min(self.block_vocab, V) if V % 128 == 0 else V
        GB = pl.cdiv(B, TB)
        GV = pl.cdiv(V, TV)

        tgt2d = target.astype(jnp.int32).reshape(B, 1)

        kernel = partial(
            _label_smoothing_kl_kernel,
            confidence=float(self.confidence),
            smoothing_value=float(self.smoothing_value),
            ignore_index=int(self.ignore_index),
            batch=B,
            vocab=V,
        )

        partials = pl.pallas_call(
            kernel,
            out_shape=jax.ShapeDtypeStruct((GB * TB, 128), jnp.float32),
            grid=(GB, GV),
            in_specs=[
                # log-prob tile, streamed (double-buffered) over the grid
                pl.BlockSpec((TB, TV), lambda i, j: (i, j)),
                # target column, resident per batch tile (not re-fetched per j)
                pl.BlockSpec((TB, 1), lambda i, j: (i, 0)),
            ],
            # lane-dense partial-sum block, resident across the vocab axis
            out_specs=pl.BlockSpec((TB, 128), lambda i, j: (i, 0)),
            compiler_params=pltpu.CompilerParams(
                dimension_semantics=("parallel", "arbitrary")),
        )(output, tgt2d)

        # Entropy term (compile-time constant per valid row) + final tiny
        # reductions done in plain JAX (negligible vs. the (B,V) stream).
        n_valid = jnp.sum((target != self.ignore_index).astype(jnp.float32))
        return self.row_entropy * n_valid - jnp.sum(partials)


def _reference(output, target, label_smoothing, vocab, ignore_index):
    # Pure-JAX reference mirroring the PyTorch forward (f32 math).
    out32 = output.astype(jnp.float32)
    smoothing_value = label_smoothing / (vocab - 2)
    confidence = 1.0 - label_smoothing
    col = jnp.arange(vocab)[None, :]
    model_prob = jnp.where(col == target[:, None], confidence, smoothing_value)
    model_prob = jnp.where((target == ignore_index)[:, None], 0.0, model_prob)
    xlogy = jnp.where(model_prob > 0, model_prob * jnp.log(model_prob), 0.0)
    return jnp.sum(xlogy - model_prob * out32)


if __name__ == "__main__":
    label_smoothing = 0.1
    vocab = 384          # multiple of 128, > block_vocab used below -> 2 vocab tiles
    batch = 10           # not a multiple of the batch tile -> exercises row masking
    ignore_index = -100

    key = jax.random.PRNGKey(0)
    k1, k2 = jax.random.split(key)
    logits = jax.random.normal(k1, (batch, vocab), dtype=jnp.float32)
    # `output` is log-probabilities (as in the PyTorch F.kl_div usage); feed bf16
    # to exercise the halved-HBM-traffic path (kernel upcasts per tile).
    output = jax.nn.log_softmax(logits, axis=-1).astype(jnp.bfloat16)
    target = jax.random.randint(k2, (batch,), 0, vocab, dtype=jnp.int32)
    target = target.at[3].set(ignore_index)   # exercise the ignore mask

    # Small tiles so the test runs a real 2x2 grid with partial tiles.
    loss_fn = LabelSmoothingLossPallas(label_smoothing, vocab, ignore_index,
                                       block_batch=8, block_vocab=256)
    loss = jax.block_until_ready(loss_fn(output, target))

    ref = _reference(output, target, label_smoothing, vocab, ignore_index)
    assert jnp.allclose(loss, ref, rtol=1e-3, atol=1e-3), (loss, ref)

    print("KERNEL_OK")
</pallas_src>

<mosaic_0001>
module attributes {stable_mosaic.version = 11 : i64} {
  func.func @_label_smoothing_kl_kernel(%arg0: i32, %arg1: i32, %arg2: memref<8x256xbf16, #tpu.memory_space<vmem>>, %arg3: memref<8x1xi32, #tpu.memory_space<vmem>>, %arg4: memref<8x128xf32, #tpu.memory_space<vmem>>) attributes {dimension_semantics = [#tpu.dimension_semantics<parallel>, #tpu.dimension_semantics<arbitrary>], iteration_bounds = array<i64: 2, 2>, scalar_prefetch = 0 : i64, scratch_operands = 0 : i64, tpu.core_type = #tpu.core_type<tc>, window_params = [{transform_indices = @transform_0, window_bounds = array<i64: 8, 256>}, {transform_indices = @transform_1, window_bounds = array<i64: 8, 1>}, {transform_indices = @transform_2, window_bounds = array<i64: 8, 128>}]} {
    %c0 = arith.constant 0 : index
    %c0_0 = arith.constant 0 : index
    %0 = vector.load %arg2[%c0, %c0_0] : memref<8x256xbf16, #tpu.memory_space<vmem>>, vector<8x256xbf16>
    %1 = arith.extf %0 : vector<8x256xbf16> to vector<8x256xf32>
    %c0_1 = arith.constant 0 : index
    %c0_2 = arith.constant 0 : index
    %2 = vector.load %arg3[%c0_1, %c0_2] : memref<8x1xi32, #tpu.memory_space<vmem>>, vector<8x1xi32>
    %c8_i32 = arith.constant 8 : i32
    %3 = arith.muli %arg0, %c8_i32 : i32
    %4 = tpu.iota {dimensions = array<i32: 0>} : vector<8x256xi32>
    %5 = vector.broadcast %3 : i32 to vector<8x256xi32>
    %6 = arith.addi %5, %4 : vector<8x256xi32>
    %c256_i32 = arith.constant 256 : i32
    %7 = arith.muli %arg1, %c256_i32 : i32
    %8 = tpu.iota {dimensions = array<i32: 1>} : vector<8x256xi32>
    %9 = vector.broadcast %7 : i32 to vector<8x256xi32>
    %10 = arith.addi %9, %8 : vector<8x256xi32>
    %c10_i32 = arith.constant 10 : i32
    %11 = vector.broadcast %c10_i32 : i32 to vector<8x256xi32>
    %12 = arith.cmpi slt, %6, %11 : vector<8x256xi32>
    %c384_i32 = arith.constant 384 : i32
    %13 = vector.broadcast %c384_i32 : i32 to vector<8x256xi32>
    %14 = arith.cmpi slt, %10, %13 : vector<8x256xi32>
    %15 = arith.andi %12, %14 : vector<8x256xi1>
    %c-100_i32 = arith.constant -100 : i32
    %16 = vector.broadcast %c-100_i32 : i32 to vector<8x1xi32>
    %17 = arith.cmpi ne, %2, %16 : vector<8x1xi32>
    %18 = vector.broadcast %17 : vector<8x1xi1> to vector<8x256xi1>
    %19 = arith.andi %15, %18 : vector<8x256xi1>
    %cst = arith.constant 0.000000e+00 : f32
    %20 = vector.broadcast %cst : f32 to vector<8x256xf32>
    %21 = arith.select %19, %1, %20 : vector<8x256xi1>, vector<8x256xf32>
    %22 = vector.broadcast %2 : vector<8x1xi32> to vector<8x256xi32>
    %23 = arith.cmpi eq, %10, %22 : vector<8x256xi32>
    %cst_3 = arith.constant 0.899999976 : f32
    %cst_4 = arith.constant 2.61780107E-4 : f32
    %24 = vector.broadcast %cst_3 : f32 to vector<8x256xf32>
    %25 = vector.broadcast %cst_4 : f32 to vector<8x256xf32>
    %26 = arith.select %23, %24, %25 : vector<8x256xi1>, vector<8x256xf32>
    %27 = arith.mulf %26, %21 : vector<8x256xf32>
    %28 = vector.extract_strided_slice %27 {offsets = [0, 0], sizes = [8, 128], strides = [1, 1]} : vector<8x256xf32> to vector<8x128xf32>
    %29 = vector.extract_strided_slice %27 {offsets = [0, 128], sizes = [8, 128], strides = [1, 1]} : vector<8x256xf32> to vector<8x128xf32>
    %30 = arith.addf %28, %29 : vector<8x128xf32>
    %c0_i32 = arith.constant 0 : i32
    %31 = arith.cmpi eq, %arg1, %c0_i32 : i32
    %32 = arith.extui %31 : i1 to i32
    %c0_i32_5 = arith.constant 0 : i32
    %33 = arith.cmpi ne, %32, %c0_i32_5 : i32
    scf.if %33 {
      %cst_10 = arith.constant 0.000000e+00 : f32
      %37 = vector.broadcast %cst_10 : f32 to vector<8x128xf32>
      %c0_11 = arith.constant 0 : index
      %c0_12 = arith.constant 0 : index
      %38 = vector.load %arg4[%c0_11, %c0_12] : memref<8x128xf32, #tpu.memory_space<vmem>>, vector<8x128xf32>
      tpu.vector_store %arg4[%c0_11, %c0_12], %37 {strides = array<i32>} : memref<8x128xf32, #tpu.memory_space<vmem>>, vector<8x128xf32>,
    } else {
    }
    %c0_6 = arith.constant 0 : index
    %c0_7 = arith.constant 0 : index
    %34 = vector.load %arg4[%c0_6, %c0_7] : memref<8x128xf32, #tpu.memory_space<vmem>>, vector<8x128xf32>
    %35 = arith.addf %34, %30 : vector<8x128xf32>
    %c0_8 = arith.constant 0 : index
    %c0_9 = arith.constant 0 : index
    %36 = vector.load %arg4[%c0_8, %c0_9] : memref<8x128xf32, #tpu.memory_space<vmem>>, vector<8x128xf32>
    tpu.vector_store %arg4[%c0_8, %c0_9], %35 {strides = array<i32>} : memref<8x128xf32, #tpu.memory_space<vmem>>, vector<8x128xf32>,
    return
  }
  func.func @transform_0(%arg0: i32, %arg1: i32) -> (i32, i32) {
    %c0_i32 = arith.constant 0 : i32
    return %arg0, %arg1 : i32, i32
  }
  func.func @transform_1(%arg0: i32, %arg1: i32) -> (i32, i32) {
    %c0_i32 = arith.constant 0 : i32
    %c0_i32_0 = arith.constant 0 : i32
    return %arg0, %c0_i32 : i32, i32
  }
  func.func @transform_2(%arg0: i32, %arg1: i32) -> (i32, i32) {
    %c0_i32 = arith.constant 0 : i32
    %c0_i32_0 = arith.constant 0 : i32
    return %arg0, %c0_i32 : i32, i32
  }
}

</mosaic_0001>

<bundles_post_ra>
// kernel: tpu_custom_call.1
= control target key start
LH: loop header
LB: loop body
LE: loop exit
PB: predicated region body
PF: predicated region fallthrough
CT: control target
= control target key end

     0   :  { %7 = vsyncpa [#allocation3], 0  ;;  %s890_s0 = inlined_call_operand.hbm [shape: bf16[10,384], index: 0, kind: input, shape index: {}]   ;;  %s891_s1 = inlined_call_operand.vmem [shape: s32[10,1], index: 1, kind: input, shape index: {}]   ;;  %s892_s2 = inlined_call_operand.hbm [shape: f32[16,128], index: 2, kind: output, shape index: {}]  }
   0x1   :  { %9 = vsyncpa [#allocation3 + $0x1], 0 }
   0x2   :  { %10 = vsyncpa [#allocation4], 0 }
   0x3   :  { %12 = vsyncpa [#allocation4 + $0x1], 0  ;;  %s673_s9 = smov 0   ;;  %s675_s10 = smov 0  }
   0x4   :  { %s677_s11 = smov 0   ;;  %s679_s12 = smov 0  }
   0x5   :  { %s681_s13 = smov 0   ;;  %s683_s14 = smov 0  }
   0x6   :  { %s685_s15 = smov 0   ;;  %s687_s16 = smov 0  }
   0x7   :  { %s689_s17 = smov 0   ;;  %s691_s18 = smov 0  }
   0x8   :  { %s693_s19 = smov 0  }
   0x9 LB: > { %898 = sst [smem:[#allocation8_spill]] %s632_s14  ;;  %s368_s20 = sadd.s32 4294967295, %s652_s19   ;;  %s652_s19 = sphi %s693_s19, %s18_s19   ;;  %s648_s18 = sphi %s691_s18, %s914_s18   ;;  %s644_s17 = sphi %s689_s17, %s913_s17   ;;  %s640_s16 = sphi %s687_s16, %s912_s16   ;;  %s636_s15 = sphi %s685_s15, %s911_s15   ;;  %s632_s14 = sphi %s683_s14, %s910_s14   ;;  %s628_s13 = sphi %s681_s13, %s919_s13   ;;  %s624_s12 = sphi %s679_s12, %s918_s12   ;;  %s620_s11 = sphi %s677_s11, %s917_s11   ;;  %s616_s10 = sphi %s675_s10, %s916_s10   ;;  %s612_s9 = sphi %s673_s9, %s915_s9  }
   0xa   : > { %899 = sst [smem:[#allocation9_spill]] %s644_s17  ;;  %s369_s21 = sadd.s32 4294967294, %s652_s19  }
   0xb   : > { %900 = sst [smem:[#allocation10_spill]] %s648_s18  ;;  %s27_s22 = sadd.s32 1, %s644_s17 }
   0xc   : > { %s30_s23 = sadd.s32 1, %s648_s18  ;;  %p28_p0 = scmp.ge.s32.totalorder %s27_s22, 2 }
   0xd   : > { %s39_s24 = sadd.s32 1, %s632_s14  ;;  %p46_p1 = scmp.ne.s32.totalorder %s632_s14, %s628_s13 }
   0xe   : > { %p47_p2 = scmp.eq.s32.totalorder %s652_s19, 0  ;;  %s921_s22 = smov (%p28_p0, %s27_s22), 0 }
   0xf   : > { %901 = sst [smem:[#allocation11_spill]] %s921_s22  ;;  %s923_s23 = smov (!%p28_p0, %s30_s23), %s648_s18 }
  0x10   : > { %s35_s25 = ssub.s32 %s644_s17, %s921_s22  ;;  %p739_p3 = por %p47_p2, %p46_p1 }
  0x11   : > { %p32_p4 = scmp.ge.s32.totalorder %s923_s23, 2  ;;  %p52_p5 = scmp.ne.s32.totalorder %s628_s13, %s624_s12 }
  0x12   : > { %p53_p6 = scmp.eq.s32.totalorder %s368_s20, 0  ;;  %s91_s27 = sadd.s32 1, %s620_s11 }
  0x13   : > { %s925_s23 = smov (%p32_p4, %s923_s23), 0  ;;  %p101_p8 = scmp.ne.s32.totalorder %s620_s11, %s616_s10 }
  0x14   : > { %903 = sst [smem:[#allocation12_spill]] %s925_s23  ;;  %p747_p7 = por %p53_p6, %p52_p5 }
  0x15   : > { %s34_s29 = ssub.s32 %s648_s18, %s925_s23  ;;  %p102_p9 = scmp.eq.s32.totalorder %s368_s20, 3 }
  0x16   : > { %s36_s30 = sor.u32 %s35_s25, %s34_s29  ;;  %p89_p10 = scmp.eq.s32.totalorder %s34_s29, 0 }
  0x17   : > { %p37_p11 = scmp.eq.s32.totalorder %s36_s30, 0  ;;  %p755_p12 = por %p102_p9, %p101_p8 }
  0x18   : > { %s760_s4 = scalar_select %p89_p10, %s620_s11, %s91_s27  }
  0x19   : > { %s763_s5 = scalar_select %p37_p11, %s632_s14, %s39_s24  }
  0x1a   : > { %p107_p13 = scmp.ne.s32.totalorder %s616_s10, %s612_s9  ;;  %p108_p0 = scmp.eq.s32.totalorder %s369_s21, 3 }
  0x1b   : > { %906 = sst [smem:[#allocation13_spill]] %s763_s5  ;;  %p371_p2 = scmp.ge.s32.totalorder %s652_s19, 4 }
  0x1c   : > { %p767_p1 = por %p108_p0, %p107_p13 }
  0x1d   : > { %124 = sbr.rel (%p371_p2) target bundleno = 72 (0x48), region = 16 }
  0x22   : > { %127 = sbr.rel (!%p739_p3) target bundleno = 72 (0x48), region = 20  ;;  %s128_s7 = sand.u32 (%p739_p3), 1, %s632_s14  }
  0x23   : > { %s373_s8 = sshll.u32 (%p739_p3), %s644_s17, 1  ;;  %s372_s12 = sshll.u32 (%p739_p3), %s128_s7, 3 }
  0x24   : > { %s134_s20 = ssub.s32 (%p739_p3), 3, %s373_s8  ;;  %s779_s27 = scalar_lea.sflag (%p739_p3), [#allocation3], %s128_s7 }
  0x25   : > { %p135_p4 = scmp.lt.s32.totalorder (%p739_p3), %s134_s20, 2  ;;  %s132_s29 = scalar_lea.vmem (%p739_p3), [#allocation2], %s372_s12 }
  0x27   : > { %s927_s20 = smov (!%p135_p4, %s134_s20), 2 }
  0x28   : > { %s374_s21 = sshll.u32 %s927_s20, 2 }
  0x29   : > { %s138_s24 = ssub.s32 8, %s374_s21 }
  0x2a   : > { %s139_s25 = sshll.u32 %s138_s24, 4 }
  0x2b   : > { %140 = vsyncadd %s779_s27, %s139_s25  ;;  %s390_s26 = smul.u32 3, %s648_s18  ;;  %s783_s30 = sshll.u32 %s132_s29, 4  ;;  %s151_s30 = int_to_ptr.vmem [resolvable:$true] %s783_s30 }
  0x2c   : > { %p785_p3 = scmp.ne.s32.totalorder %s374_s21, 0  ;;  %s378_s24 = sshll.u32 %s927_s20, 6 }
  0x2d   : > { %s143_s22 = sadd.s32 %s390_s26, %s373_s8  ;;  %s493_s29 = sshrl.u32 %s378_s24, 4 }
  0x2e   : > { %s376_s17 = sshll.u32 %s143_s22, 2  ;;  %s502_s22 = scalar_lea.hbm %s890_s0, 24 }
  0x2f   : > { %s145_s12 = scalar_lea.hbm %s890_s0, %s376_s17 }
  0x30   : > { %s148_s25 = sshll.u32 %s145_s12, 4  ;;  %s149_s25 = int_to_ptr.hbm [resolvable:$true] %s148_s25 }
  0x31   : > { %s491_s14 = sshra.s32 %s149_s25, 4  ;;  %s492_s14 = int_to_ptr.hbm [resolvable:$true] %s491_s14 }
  0x32   : > { %s498_s18 = scalar_lea.hbm %s492_s14, %s493_s29 }
  0x33   : > { %p499_p5 = scmp.ne.s32.totalorder %s492_s14, %s498_s18  ;;  %p504_p9 = scmp.lt.s32.totalorder %s502_s22, %s498_s18 }
  0x35   : > { %p500_p6 = pnand %p499_p5, %p785_p3 }
  0x37   : > { %p501_p8 = pneg %p500_p6 }
  0x39   : > { %p506_p10 = pnand %p504_p9, %p501_p8 }
  0x3b   : > { %509 = shalt.err (!%p506_p10)
}
  0x3c   : > { %s510_s17 = sshra.s32 %s151_s30, 4  ;;  %s654_s26 = smov [#allocation2]   ;;  %s511_s17 = int_to_ptr.vmem [resolvable:$true] %s510_s17 }
  0x3d   : > { %s517_s5 = scalar_lea.vmem %s511_s17, %s493_s29  ;;  %s521_s14 = scalar_lea.vmem %s654_s26, 16 }
  0x3e   : > { %p518_p11 = scmp.ne.s32.totalorder %s511_s17, %s517_s5  ;;  %p523_p2 = scmp.lt.s32.totalorder %s521_s14, %s517_s5 }
  0x40   : > { %p519_p13 = pnand %p518_p11, %p785_p3 }
  0x42   : > { %p520_p0 = pneg %p519_p13 }
  0x44   : > { %p525_p4 = pnand %p523_p2, %p520_p0 }
  0x46   : > { %528 = shalt.err (!%p525_p4)
}
  0x47   : > { %153 = dma.hbm_to_vmem [thread:$0]  (%p785_p3), %s149_s25, %s378_s24, %s151_s30, %s779_s27  }
  0x48 PF: > { %p379_p5 = scmp.ge.s32.totalorder %s652_s19, 1  ;;  %p162_p6 = scmp.lt.s32.totalorder %s652_s19, 5 }
  0x4a   : > { %p163_p8 = pnand %p379_p5, %p162_p6 }
  0x4b   : > { %s168_s18 = sand.u32 (!%p163_p8), 1, %s628_s13  }
  0x4c   : > { %166 = sbr.rel (%p163_p8) target bundleno = 235 (0xeb), region = 28  ;;  %s811_s7 = sshll.u32 (!%p163_p8), %s168_s18, 3 }
  0x4d   : > { %s169_s12 = scalar_lea.sflag (!%p163_p8), [#allocation3], %s168_s18  ;;  %s172_s23 = scalar_lea.vmem (!%p163_p8), [#allocation2], %s811_s7 }
  0x51   : > { %603 = dma.done.wait (%p747_p7), %s169_s12, 128  }
  0x52   : > { %605 = vsyncadd (%p747_p7), %s169_s12, 4294967168  ;;  %p203_p3 = scmp.lt.s32.totalorder %s640_s16, 1  ;;  %v655_v0 = vmov 0   ;;  %s195_s28 = sand.u32 1, %s616_s10   ;;  %v212_v3 = vlaneseq  ;;  %v207_v13 = vld [vmem:[%s172_s23] sm:$0xff] }
  0x53   : > { %490 = vset.pattern.permute.xlu0 %v655_v0  ;;  %s826_s29 = sshll.u32 %s195_s28, 3  ;;  %s383_s21 = sshll.u32 %s640_s16, 3  ;;  %v208_v14 = vunpack.c.l.bf16 %v207_v13  ;;  %v209_v15 = vunpack.c.h.bf16 %v207_v13  ;;  %v656_v19 = vmov 0.0002617801  }
  0x54   : > { %s204_s20 = scalar_select %p203_p3, %s640_s16, 1  ;;  %v218_v4 = vand.u32 127, %v212_v3  ;;  %v213_v5 = vshrl.u32 %v212_v3, 7  ;;  %v214_v6 = vstv %s383_s21 }
  0x55   : > { %s384_s8 = sshll.u32 %s636_s15, 8  ;;  %s197_s22 = scalar_lea.vmem [#allocation5], %s826_s29 }
  0x56   : > { %s382_s27 = sshll.u32 %s204_s20, 3  ;;  %v219_v7 = vadd.s32 128, %v218_v4  ;;  %v220_v8 = vstv %s384_s8  ;;  %v215_v9 = vadd.s32 %v214_v6, %v213_v5  ;;  %p385_p7 = scmp.ne.s32.totalorder %s636_s15, 0 }
  0x57   : > { %s206_s25 = scalar_lea.vmem %s891_s1, %s382_s27  ;;  %v221_v10 = vadd.s32 %v220_v8, %v218_v4 }
  0x58   : > { %v210_v1 = vld [vmem:[%s206_s25] sm:$0xff]  ;;  %v222_v11 = vadd.s32 %v220_v8, %v219_v7  ;;  %vm223_vm1 = vcmp.lt.s32.totalorder %v215_v9, 10 }
  0x59   : > { %vm228_vm0 = vcmp.ne.s32.totalorder %v210_v1, 4294967196  ;;  %vm224_vm2 = vcmp.lt.s32.totalorder %v221_v10, 384 }
  0x5a   : > { %v229_v2 = vsel %vm228_vm0, 1, %v655_v0  ;;  %vm225_vm3 = vcmp.lt.s32.totalorder %v222_v11, 384  ;;  %vm226_vm4 = vmand %vm223_vm1, %vm224_vm2 }
  0x5b   : > { %231 = vperm.xlu0 %490, %v229_v2   ;;  %vm227_vm6 = vmand %vm223_vm1, %vm225_vm3 }
  0x63   : > { %239 = vperm.xlu0 %490, %v210_v1  }
  0xcd   : > { %v232_v12 = vpop.permute.xlu0 %231 }
  0xce   : > { %vm233_vm5 = vcmp.eq.s32.totalorder %v232_v12, 1 }
  0xcf   : > { %vm234_vm7 = vmand %vm226_vm4, %vm233_vm5 }
  0xd0   : > { %vm235_vm8 = vmand %vm227_vm6, %vm233_vm5  ;;  %v236_v17 = vsel %vm234_vm7, %v208_v14, 0.0 }
  0xd1   : > { %v237_v18 = vsel %vm235_vm8, %v209_v15, 0.0 }
  0xd5   : > { %v240_v16 = vpop.permute.xlu0 %239 }
  0xd6   : > { %vm241_vm9 = vcmp.eq.s32.totalorder %v221_v10, %v240_v16  ;;  %vm242_vm10 = vcmp.eq.s32.totalorder %v222_v11, %v240_v16  ;;  %251 = sbr.rel (%p385_p7) target bundleno = 221 (0xdd), region = 36 }
  0xd7   : > { %v243_v20 = vsel %vm241_vm9, 0.9, %v656_v19  ;;  %v244_v21 = vsel %vm242_vm10, 0.9, %v656_v19 }
  0xd8   : > { %v245_v22 = vmul.f32 %v243_v20, %v236_v17  ;;  %v246_v23 = vmul.f32 %v244_v21, %v237_v18 }
  0xda   : > { %v247_v24 = vadd.f32 %v246_v23, %v245_v22 }
  0xdb   : > { %v657_v25 = vmov 0.0  }
  0xdc   : > { %252 = vst [vmem:[%s197_s22] sm:$0xff] %v657_v25 }
  0xdd PF: > { %s267_s26 = scalar_lea.hbm %s892_s2, %s383_s21  ;;  %s269_s14 = sshll.u32 %s197_s22, 4  ;;  %s270_s14 = int_to_ptr.vmem [resolvable:$true] %s269_s14 }
  0xde   : > { %s271_s18 = sshll.u32 %s267_s26, 4  ;;  %s257_s15 = scalar_lea.sflag [#allocation4], %s195_s28  ;;  %s272_s18 = int_to_ptr.hbm [resolvable:$true] %s271_s18 }
  0xdf   : > { %s544_s7 = sshra.s32 %s272_s18, 4  ;;  %s550_s20 = scalar_lea.hbm %s892_s2, 16  ;;  %s545_s7 = int_to_ptr.hbm [resolvable:$true] %s544_s7 }
  0xe0   : > { %s546_s12 = scalar_lea.hbm %s545_s7, 8  ;;  %p551_p13 = scmp.lt.s32.totalorder %s545_s7, %s892_s2 }
  0xe1   : > { %p547_p9 = scmp.ne.s32.totalorder %s545_s7, %s546_s12  ;;  %p552_p0 = scmp.lt.s32.totalorder %s550_s20, %s546_s12 }
  0xe3   : > { %v253_v26 = vld [vmem:[%s197_s22] sm:$0xff]  ;;  %p548_p10 = pnand %p547_p9, %p755_p12  ;;  %p553_p2 = por %p552_p0, %p551_p13 }
  0xe4   : > { %v254_v27 = vadd.f32 %v253_v26, %v247_v24 }
  0xe5   : > { %p549_p11 = pneg %p548_p10 }
  0xe6   : > { %255 = vst [vmem:[%s197_s22] sm:$0xff] %v254_v27 }
  0xe7   : > { %p554_p4 = pnand %p553_p2, %p549_p11 }
  0xe9   : > { %557 = shalt.err (!%p554_p4)
}
  0xea   : > { %392 = dma.vmem_to_hbm [thread:$0]  (%p755_p12), %s270_s14, 128, %s272_s18, %s257_s15  }
  0xeb PF: > { %p398_p5 = scmp.ge.s32.totalorder %s652_s19, 2  ;;  %s283_s24 = sand.u32 1, %s612_s9  }
  0xec   : > { %s284_s25 = scalar_lea.sflag [#allocation4], %s283_s24 }
  0xed   : > { %p395_p6 = pnand %p398_p5, %p767_p1 }
  0xef   : > { %p396_p8 = pneg %p395_p6 }
  0xf1   : > { %607 = dma.done.wait (%p396_p8), %s284_s25, 128  }
  0xf2   : > { %609 = vsyncadd (%p396_p8), %s284_s25, 4294967168  ;;  %s18_s19 = sadd.s32 1, %s652_s19   ;;  %s909_s3 = sld [smem:[#allocation8_spill]] }
  0xf3   : > { %p15_p3 = scmp.ge.s32.totalorder %s18_s19, 6   ;;  %s910_s14 = sld [smem:[#allocation13_spill]] }
  0xf4   : > { %s911_s15 = sld [smem:[#allocation9_spill]]  ;;  %s915_s9 = smov %s616_s10 }
  0xf5   : > { %s912_s16 = sld [smem:[#allocation10_spill]]  ;;  %s916_s10 = smov %s620_s11 }
  0xf6   : > { %s913_s17 = sld [smem:[#allocation11_spill]]  ;;  %s917_s11 = smov %s760_s4 }
  0xf7   : > { %s914_s18 = sld [smem:[#allocation12_spill]]  ;;  %s918_s12 = smov %s628_s13 }
  0xf8   : > { %s919_s13 = smov %s909_s3  ;;  %17 = sbr.rel (!%p15_p3) target bundleno = 9 (0x9), region = 80 }
  0xfd   :  { %290 = vsyncpa [#allocation3], 1 }
  0xfe   :  { %292 = vsyncpa [#allocation3 + $0x1], 1 }
  0xff   :  { %293 = vsyncpa [#allocation4], 1 }
 0x100   :  { %295 = vsyncpa [#allocation4 + $0x1], 1 }

</bundles_post_ra>
